<compile_context>
chip_gen: v7x
topology: tpu7x:2x2x1
jax: 0.10.0
libtpu: 0.0.40
codegen_flags: <defaults>
</compile_context>

<pallas_src>
import functools

import numpy as np
import jax
import jax.numpy as jnp
from jax.experimental import pallas as pl
from jax.experimental.pallas import tpu as pltpu


_VMEM_LIMIT = 48 * 1024 * 1024  # fits comfortably under v7x's 64 MiB VMEM


def _round_up(x, m):
    return (x + m - 1) // m * m


def _compiler_params(*semantics):
    return pltpu.CompilerParams(dimension_semantics=tuple(semantics),
                                vmem_limit_bytes=_VMEM_LIMIT)


# ----------------------------------------------------------------------------
# Tiled matmul kernel: bf16 MXU, f32 accumulation, fused BN scale/bias,
# optional fused residual add and ReLU.
# ----------------------------------------------------------------------------

def _mm_kernel(a_ref, b_ref, s_ref, t_ref, o_ref, *, relu):
    acc = jnp.dot(a_ref[...], b_ref[...], preferred_element_type=jnp.float32)
    out = acc * s_ref[...] + t_ref[...]
    if relu:
        out = jnp.maximum(out, 0.0)
    o_ref[...] = out


def _mm_res_kernel(a_ref, b_ref, s_ref, t_ref, r_ref, o_ref, *, relu):
    acc = jnp.dot(a_ref[...], b_ref[...], preferred_element_type=jnp.float32)
    out = acc * s_ref[...] + t_ref[...] + r_ref[...]
    if relu:
        out = jnp.maximum(out, 0.0)
    o_ref[...] = out


@functools.partial(jax.jit, static_argnames=("relu",))
def matmul_affine(a, b, scale, bias, residual=None, relu=False):
    """o = act(a @ b * scale + bias [+ residual]).

    a:(M,K) b:(K,N) scale,bias:(1,N) residual:(M,N)|None, all f32 in/out.
    MXU operands are bf16 (f32 accumulation); scale/bias/residual/ReLU in f32.
    Tiled over M with a parallel grid axis (pipelining + v7x megacore).
    """
    M, K = a.shape
    N = b.shape[1]
    tm = 256 if M > 256 else _round_up(M, 8)
    mp = _round_up(M, tm)
    if mp != M:
        a = jnp.pad(a, ((0, mp - M), (0, 0)))
        if residual is not None:
            residual = jnp.pad(residual, ((0, mp - M), (0, 0)))
    a16 = a.astype(jnp.bfloat16)
    b16 = b.astype(jnp.bfloat16)

    in_specs = [
        pl.BlockSpec((tm, K), lambda i: (i, 0)),
        pl.BlockSpec((K, N), lambda i: (0, 0)),
        pl.BlockSpec((1, N), lambda i: (0, 0)),
        pl.BlockSpec((1, N), lambda i: (0, 0)),
    ]
    args = [a16, b16, scale, bias]
    if residual is None:
        kernel = functools.partial(_mm_kernel, relu=relu)
    else:
        kernel = functools.partial(_mm_res_kernel, relu=relu)
        in_specs.append(pl.BlockSpec((tm, N), lambda i: (i, 0)))
        args.append(residual)

    flops = 2 * mp * K * N
    bytes_accessed = a16.size * 2 + b16.size * 2 + mp * N * 4 + 2 * N * 4
    if residual is not None:
        bytes_accessed += mp * N * 4

    out = pl.pallas_call(
        kernel,
        grid=(mp // tm,),
        in_specs=in_specs,
        out_specs=pl.BlockSpec((tm, N), lambda i: (i, 0)),
        out_shape=jax.ShapeDtypeStruct((mp, N), jnp.float32),
        compiler_params=_compiler_params("parallel"),
        cost_estimate=pl.CostEstimate(flops=int(flops), transcendentals=0,
                                      bytes_accessed=int(bytes_accessed)),
    )(*args)
    return out if mp == M else out[:M]


# ----------------------------------------------------------------------------
# Depthwise 3x3 kernels (fused BN + ReLU), gridded over (batch, channel tiles).
# Stride-2 is computed directly on even/odd row/col phases of the padded input.
# ----------------------------------------------------------------------------

def _dw_s1_kernel(x_ref, w_ref, s_ref, t_ref, o_ref):
    ho, wo, c = o_ref.shape
    acc = jnp.zeros((ho, wo, c), jnp.float32)
    for dh in range(3):
        for dw in range(3):
            tap = x_ref[pl.ds(dh, ho), pl.ds(dw, wo), :]
            wk = w_ref[pl.ds(dh * 3 + dw, 1), :].reshape(1, 1, c)
            acc = acc + tap * wk
    scale = s_ref[pl.ds(0, 1), :].reshape(1, 1, c)
    shift = t_ref[pl.ds(0, 1), :].reshape(1, 1, c)
    o_ref[...] = jnp.maximum(acc * scale + shift, 0.0)


def _dw_s2_kernel(xee_ref, xeo_ref, xoe_ref, xoo_ref, w_ref, s_ref, t_ref, o_ref):
    ho, wo, c = o_ref.shape
    phases = ((xee_ref, xeo_ref), (xoe_ref, xoo_ref))
    acc = jnp.zeros((ho, wo, c), jnp.float32)
    for dh in range(3):
        for dw in range(3):
            ph = phases[dh % 2][dw % 2]
            tap = ph[pl.ds(dh // 2, ho), pl.ds(dw // 2, wo), :]
            wk = w_ref[pl.ds(dh * 3 + dw, 1), :].reshape(1, 1, c)
            acc = acc + tap * wk
    scale = s_ref[pl.ds(0, 1), :].reshape(1, 1, c)
    shift = t_ref[pl.ds(0, 1), :].reshape(1, 1, c)
    o_ref[...] = jnp.maximum(acc * scale + shift, 0.0)


@functools.partial(jax.jit, static_argnames=("stride",))
def dwconv3x3(x, w, scale, bias, stride=1):
    """Depthwise 3x3 conv, padding=1, groups=C, fused BN+ReLU. x: NHWC f32."""
    n, h, wd, c = x.shape
    w2 = w.reshape(9, c)
    s2 = scale.reshape(1, c)
    b2 = bias.reshape(1, c)
    tc = 128 if (c > 128 and c % 128 == 0) else c
    nc = c // tc
    ho = (h + 2 - 3) // stride + 1
    wo = (wd + 2 - 3) // stride + 1
    xp = jnp.pad(x, ((0, 0), (1, 1), (1, 1), (0, 0)))

    flops = 2 * 9 * n * ho * wo * c
    bytes_accessed = xp.size * 4 + n * ho * wo * c * 4 + w2.size * 4
    cost = pl.CostEstimate(flops=int(flops), transcendentals=0,
                           bytes_accessed=int(bytes_accessed))

    if stride == 1:
        hp, wp = h + 2, wd + 2
        return pl.pallas_call(
            _dw_s1_kernel,
            grid=(n, nc),
            in_specs=[
                pl.BlockSpec((None, hp, wp, tc), lambda i, j: (i, 0, 0, j)),
                pl.BlockSpec((9, tc), lambda i, j: (0, j)),
                pl.BlockSpec((1, tc), lambda i, j: (0, j)),
                pl.BlockSpec((1, tc), lambda i, j: (0, j)),
            ],
            out_specs=pl.BlockSpec((None, ho, wo, tc), lambda i, j: (i, 0, 0, j)),
            out_shape=jax.ShapeDtypeStruct((n, ho, wo, c), jnp.float32),
            compiler_params=_compiler_params("parallel", "parallel"),
            cost_estimate=cost,
        )(xp, w2, s2, b2)

    # stride == 2: phase-split the padded input so the kernel only computes the
    # strided outputs (no stride-1 superset + subsample).
    he, we = ho + 1, wo + 1

    def phase(rp, cp):
        ph = xp[:, rp::2, cp::2, :]
        return jnp.pad(ph, ((0, 0), (0, he - ph.shape[1]),
                            (0, we - ph.shape[2]), (0, 0)))

    xee, xeo = phase(0, 0), phase(0, 1)
    xoe, xoo = phase(1, 0), phase(1, 1)
    phase_spec = pl.BlockSpec((None, he, we, tc), lambda i, j: (i, 0, 0, j))
    return pl.pallas_call(
        _dw_s2_kernel,
        grid=(n, nc),
        in_specs=[
            phase_spec, phase_spec, phase_spec, phase_spec,
            pl.BlockSpec((9, tc), lambda i, j: (0, j)),
            pl.BlockSpec((1, tc), lambda i, j: (0, j)),
            pl.BlockSpec((1, tc), lambda i, j: (0, j)),
        ],
        out_specs=pl.BlockSpec((None, ho, wo, tc), lambda i, j: (i, 0, 0, j)),
        out_shape=jax.ShapeDtypeStruct((n, ho, wo, c), jnp.float32),
        compiler_params=_compiler_params("parallel", "parallel"),
        cost_estimate=cost,
    )(xee, xeo, xoe, xoo, w2, s2, b2)


# ----------------------------------------------------------------------------
# Separable linear maps (adaptive avg pool / bilinear resize, align_corners=True)
# applied without any XLA transposes between the two passes.
# ----------------------------------------------------------------------------

def adaptive_pool_matrix(out_size, in_size):
    m = np.zeros((out_size, in_size), np.float32)
    for i in range(out_size):
        s = (i * in_size) // out_size
        e = -(-((i + 1) * in_size) // out_size)  # ceil
        m[i, s:e] = 1.0 / (e - s)
    return jnp.asarray(m)


def bilinear_matrix(out_size, in_size):
    """Row-interp matrix for F.interpolate(mode='bilinear', align_corners=True)."""
    m = np.zeros((out_size, in_size), np.float32)
    if in_size == 1:
        m[:, 0] = 1.0
        return jnp.asarray(m)
    if out_size == 1:
        m[0, 0] = 1.0
        return jnp.asarray(m)
    scale = (in_size - 1) / (out_size - 1)
    for i in range(out_size):
        src = i * scale
        lo = int(np.floor(src))
        hi = min(lo + 1, in_size - 1)
        frac = src - lo
        m[i, lo] += 1.0 - frac
        m[i, hi] += frac
    return jnp.asarray(m)


def _resize_rows_kernel(m_ref, x_ref, o_ref):
    o_ref[...] = jnp.dot(m_ref[...], x_ref[...], preferred_element_type=jnp.float32)


def _resize_cols_kernel(m_ref, x_ref, o_ref):
    t = x_ref.shape[0]
    b, w = m_ref.shape
    mb = jnp.broadcast_to(m_ref[...].reshape(1, b, w), (t, b, w))
    o_ref[...] = jnp.einsum("tbw,twc->tbc", mb, x_ref[...],
                            preferred_element_type=jnp.float32)


@jax.jit
def _apply_rows(x, m):
    """Apply (A,H) matrix along axis 1 of NHWC x -> (N,A,W,C)."""
    n, h, w, c = x.shape
    a = m.shape[0]
    xf = x.reshape(n, h, w * c)
    out = pl.pallas_call(
        _resize_rows_kernel,
        grid=(n,),
        in_specs=[
            pl.BlockSpec((a, h), lambda i: (0, 0)),
            pl.BlockSpec((None, h, w * c), lambda i: (i, 0, 0)),
        ],
        out_specs=pl.BlockSpec((None, a, w * c), lambda i: (i, 0, 0)),
        out_shape=jax.ShapeDtypeStruct((n, a, w * c), jnp.float32),
        compiler_params=_compiler_params("parallel"),
    )(m, xf)
    return out.reshape(n, a, w, c)


@jax.jit
def _apply_cols(x, m):
    """Apply (B,W) matrix along axis 2 of NHWC x -> (N,H,B,C)."""
    n, h, w, c = x.shape
    b = m.shape[0]
    rows = n * h
    xf = x.reshape(rows, w, c)
    t = min(64, rows)
    rp = _round_up(rows, t)
    if rp != rows:
        xf = jnp.pad(xf, ((0, rp - rows), (0, 0), (0, 0)))
    out = pl.pallas_call(
        _resize_cols_kernel,
        grid=(rp // t,),
        in_specs=[
            pl.BlockSpec((b, w), lambda i: (0, 0)),
            pl.BlockSpec((t, w, c), lambda i: (i, 0, 0)),
        ],
        out_specs=pl.BlockSpec((t, b, c), lambda i: (i, 0, 0)),
        out_shape=jax.ShapeDtypeStruct((rp, b, c), jnp.float32),
        compiler_params=_compiler_params("parallel"),
    )(m, xf)
    if rp != rows:
        out = out[:rows]
    return out.reshape(n, h, b, c)


def resize_bilinear(x, ho, wo):
    _, h, w, _ = x.shape
    x = _apply_rows(x, bilinear_matrix(ho, h))
    x = _apply_cols(x, bilinear_matrix(wo, w))
    return x


def adaptive_avg_pool(x, size):
    _, h, w, _ = x.shape
    x = _apply_rows(x, adaptive_pool_matrix(size, h))
    x = _apply_cols(x, adaptive_pool_matrix(size, w))
    return x


# ----------------------------------------------------------------------------
# Layer helpers (conv weights + folded-BN scale/bias)
# ----------------------------------------------------------------------------

def pointwise(x, p, relu, residual=None):
    n, h, w, c = x.shape
    a = x.reshape(n * h * w, c)
    res = None if residual is None else residual.reshape(n * h * w, -1)
    o = matmul_affine(a, p["w"], p["s"].reshape(1, -1), p["b"].reshape(1, -1),
                      residual=res, relu=relu)
    return o.reshape(n, h, w, -1)


def conv_bn_relu_3x3(x, p, stride):
    """Standard 3x3 conv, padding=0 (per _ConvBNReLU default), BN + ReLU, via im2col."""
    n, h, w, c = x.shape
    ho = (h - 3) // stride + 1
    wo = (w - 3) // stride + 1
    cols = []
    for dh in range(3):
        for dw in range(3):
            cols.append(
                x[:, dh:dh + (ho - 1) * stride + 1:stride,
                     dw:dw + (wo - 1) * stride + 1:stride, :])
    patches = jnp.concatenate(cols, axis=-1).reshape(n * ho * wo, 9 * c)
    wm = p["w"].reshape(9 * c, -1)
    o = matmul_affine(patches, wm, p["s"].reshape(1, -1), p["b"].reshape(1, -1),
                      relu=True)
    return o.reshape(n, ho, wo, -1)


def dsconv(x, p, stride):
    x = dwconv3x3(x, p["dw"]["w"], p["dw"]["s"], p["dw"]["b"], stride=stride)
    return pointwise(x, p["pw"], relu=True)


def bottleneck(x, p, stride):
    cin = x.shape[-1]
    out = pointwise(x, p["exp"], relu=True)
    out = dwconv3x3(out, p["dw"]["w"], p["dw"]["s"], p["dw"]["b"], stride=stride)
    cout = p["proj"]["w"].shape[-1]
    if stride == 1 and cin == cout:
        # residual add fused into the projection matmul (no extra HBM round-trip)
        return pointwise(out, p["proj"], relu=False, residual=x)
    return pointwise(out, p["proj"], relu=False)


def pyramid_pooling(x, p):
    _, h, w, _ = x.shape
    feats = [x]
    for i, size in enumerate((1, 2, 3, 6)):
        f = adaptive_avg_pool(x, size)
        f = pointwise(f, p["convs"][i], relu=True)
        f = resize_bilinear(f, h, w)
        feats.append(f)
    cat = jnp.concatenate(feats, axis=-1)
    return pointwise(cat, p["out"], relu=True)


def feature_fusion(higher, lower, p):
    hh, wh = lower.shape[1] * 4, lower.shape[2] * 4
    low = resize_bilinear(lower, hh, wh)
    low = dwconv3x3(low, p["dw"]["w"], p["dw"]["s"], p["dw"]["b"], stride=1)
    low = pointwise(low, p["low"], relu=False)
    # high-res 1x1 conv with the fusion add + ReLU folded into the same matmul
    return pointwise(higher, p["high"], relu=True, residual=low)


def classifier_head(x, p):
    x = dsconv(x, p["ds1"], stride=1)
    x = dsconv(x, p["ds2"], stride=1)
    # Dropout(0.1) is identity in eval mode.
    # Final 1x1 conv output channels are zero-padded to 128 (lane-dense) so the
    # subsequent bilinear resize stores full vregs; sliced back in the wrapper.
    return pointwise(x, p["final"], relu=False)


# ----------------------------------------------------------------------------
# Deterministic parameter construction (synthetic, no checkpoint)
# ----------------------------------------------------------------------------

class ParamGen:
    def __init__(self, seed=0):
        self.key = jax.random.PRNGKey(seed)
        self.i = 0

    def _draw(self, shape, std):
        self.i += 1
        return std * jax.random.normal(
            jax.random.fold_in(self.key, self.i), shape, dtype=jnp.float32)

    def _bn(self, c):
        gamma = 1.0 + self._draw((c,), 0.05)
        beta = self._draw((c,), 0.05)
        # inference BN: running_mean=0, running_var=1, eps=1e-5
        scale = gamma / jnp.sqrt(1.0 + 1e-5)
        return scale, beta

    def conv_bn(self, cin, cout, k=1):
        fan_in = k * k * cin
        shape = (cin, cout) if k == 1 else (k, k, cin, cout)
        w = self._draw(shape, (2.0 / fan_in) ** 0.5)
        s, b = self._bn(cout)
        return {"w": w, "s": s, "b": b}

    def conv_bias_bn(self, cin, cout):
        w = self._draw((cin, cout), (2.0 / cin) ** 0.5)
        cb = self._draw((cout,), 0.05)
        s, beta = self._bn(cout)
        return {"w": w, "s": s, "b": cb * s + beta}

    def conv_bias(self, cin, cout):
        w = self._draw((cin, cout), (1.0 / cin) ** 0.5)
        cb = self._draw((cout,), 0.05)
        return {"w": w, "s": jnp.ones((cout,), jnp.float32), "b": cb}

    def dw_bn(self, c):
        w = self._draw((3, 3, c), (2.0 / 9.0) ** 0.5)
        s, b = self._bn(c)
        return {"w": w, "s": s, "b": b}

    def dsconv(self, cin, cout):
        return {"dw": self.dw_bn(cin), "pw": self.conv_bn(cin, cout)}

    def bottleneck(self, cin, cout, t=6):
        return {"exp": self.conv_bn(cin, cin * t),
                "dw": self.dw_bn(cin * t),
                "proj": self.conv_bn(cin * t, cout)}


def init_params(num_classes, t=6):
    g = ParamGen(0)
    p = {}
    p["ltd"] = {"conv": g.conv_bn(3, 32, k=3),
                "ds1": g.dsconv(32, 48),
                "ds2": g.dsconv(48, 64)}

    def make_layer(cin, cout, n, stride):
        blocks = [(g.bottleneck(cin, cout, t), stride)]
        for _ in range(1, n):
            blocks.append((g.bottleneck(cout, cout, t), 1))
        return blocks

    p["b1"] = make_layer(64, 64, 3, 2)
    p["b2"] = make_layer(64, 96, 3, 2)
    p["b3"] = make_layer(96, 128, 3, 1)
    p["ppm"] = {"convs": [g.conv_bn(128, 32) for _ in range(4)],
                "out": g.conv_bn(256, 128)}
    p["ffm"] = {"dw": g.dw_bn(128),
                "low": g.conv_bias_bn(128, 128),
                "high": g.conv_bias_bn(64, 128)}

    # Final classifier: pad output channels to a lane-dense multiple of 128.
    cpad = _round_up(num_classes, 128)
    final = g.conv_bias(128, num_classes)
    final_padded = {"w": jnp.pad(final["w"], ((0, 0), (0, cpad - num_classes))),
                    "s": jnp.ones((cpad,), jnp.float32),
                    "b": jnp.pad(final["b"], (0, cpad - num_classes))}
    p["cls"] = {"ds1": g.dsconv(128, 128),
                "ds2": g.dsconv(128, 128),
                "final": final_padded}
    p["num_classes"] = num_classes
    return p


# ----------------------------------------------------------------------------
# Full FastSCNN forward (aux=False)
# ----------------------------------------------------------------------------

def fast_scnn_forward(params, x_nchw):
    n, c, h, w = x_nchw.shape
    x = jnp.transpose(x_nchw, (0, 2, 3, 1)).astype(jnp.float32)  # -> NHWC

    # Learning to downsample
    hi = conv_bn_relu_3x3(x, params["ltd"]["conv"], stride=2)
    hi = dsconv(hi, params["ltd"]["ds1"], stride=2)
    hi = dsconv(hi, params["ltd"]["ds2"], stride=2)

    # Global feature extractor
    y = hi
    for blocks in (params["b1"], params["b2"], params["b3"]):
        for bp, stride in blocks:
            y = bottleneck(y, bp, stride)
    y = pyramid_pooling(y, params["ppm"])

    # Feature fusion + classifier (classifier output stays 128-channel padded)
    y = feature_fusion(hi, y, params["ffm"])
    y = classifier_head(y, params["cls"])

    # Final bilinear upsample (align_corners=True) back to input size; the
    # resize runs lane-dense (128 channels), then the real classes are sliced.
    y = resize_bilinear(y, h, w)
    y = y[..., :params["num_classes"]]
    out = jnp.transpose(y, (0, 3, 1, 2))  # -> NCHW, like PyTorch
    return (out,)


if __name__ == "__main__":
    num_classes = 6
    params = init_params(num_classes)
    key = jax.random.PRNGKey(0)
    x = jax.random.normal(key, (2, 3, 64, 64), jnp.float32)  # NCHW input

    outputs = fast_scnn_forward(params, x)
    out = jax.block_until_ready(outputs[0])

    assert out.shape == (2, num_classes, 64, 64), out.shape
    assert bool(jnp.all(jnp.isfinite(out)))
    print("KERNEL_OK")
</pallas_src>

<mosaic_0001>
module attributes {stable_mosaic.version = 11 : i64} {
  func.func @_mm_kernel(%arg0: i32, %arg1: memref<256x27xbf16, #tpu.memory_space<vmem>>, %arg2: memref<27x32xbf16, #tpu.memory_space<vmem>>, %arg3: memref<1x32xf32, #tpu.memory_space<vmem>>, %arg4: memref<1x32xf32, #tpu.memory_space<vmem>>, %arg5: memref<256x32xf32, #tpu.memory_space<vmem>>) attributes {dimension_semantics = [#tpu.dimension_semantics<parallel>], iteration_bounds = array<i64: 8>, scalar_prefetch = 0 : i64, scratch_operands = 0 : i64, tpu.core_type = #tpu.core_type<tc>, window_params = [{transform_indices = @transform_0, window_bounds = array<i64: 256, 27>}, {pipeline_mode = #tpu.pipeline_mode<synchronous>, transform_indices = @transform_1, window_bounds = array<i64: 27, 32>}, {pipeline_mode = #tpu.pipeline_mode<synchronous>, transform_indices = @transform_2, window_bounds = array<i64: 1, 32>}, {pipeline_mode = #tpu.pipeline_mode<synchronous>, transform_indices = @transform_3, window_bounds = array<i64: 1, 32>}, {transform_indices = @transform_4, window_bounds = array<i64: 256, 32>}]} {
    %c0 = arith.constant 0 : index
    %c0_0 = arith.constant 0 : index
    %0 = vector.load %arg1[%c0, %c0_0] : memref<256x27xbf16, #tpu.memory_space<vmem>>, vector<256x27xbf16>
    %c0_1 = arith.constant 0 : index
    %c0_2 = arith.constant 0 : index
    %1 = vector.load %arg2[%c0_1, %c0_2] : memref<27x32xbf16, #tpu.memory_space<vmem>>, vector<27x32xbf16>
    %cst = arith.constant dense<0.000000e+00> : vector<256x32xf32>
    %2 = tpu.matmul %0, %1, %cst {dimension_numbers = #tpu.dot_dimension_numbers<[1], [0], [0], [1], [0, 0, 1, 1], [], []>} : vector<256x27xbf16>, vector<27x32xbf16>, vector<256x32xf32> -> vector<256x32xf32>
    %c0_3 = arith.constant 0 : index
    %c0_4 = arith.constant 0 : index
    %3 = vector.load %arg3[%c0_3, %c0_4] : memref<1x32xf32, #tpu.memory_space<vmem>>, vector<1x32xf32>
    %4 = vector.broadcast %3 : vector<1x32xf32> to vector<256x32xf32>
    %5 = arith.mulf %2, %4 : vector<256x32xf32>
    %c0_5 = arith.constant 0 : index
    %c0_6 = arith.constant 0 : index
    %6 = vector.load %arg4[%c0_5, %c0_6] : memref<1x32xf32, #tpu.memory_space<vmem>>, vector<1x32xf32>
    %7 = vector.broadcast %6 : vector<1x32xf32> to vector<256x32xf32>
    %8 = arith.addf %5, %7 : vector<256x32xf32>
    %cst_7 = arith.constant 0.000000e+00 : f32
    %9 = vector.broadcast %cst_7 : f32 to vector<256x32xf32>
    %10 = arith.maximumf %8, %9 : vector<256x32xf32>
    %c0_8 = arith.constant 0 : index
    %c0_9 = arith.constant 0 : index
    %11 = vector.load %arg5[%c0_8, %c0_9] : memref<256x32xf32, #tpu.memory_space<vmem>>, vector<256x32xf32>
    tpu.vector_store %arg5[%c0_8, %c0_9], %10 {strides = array<i32>} : memref<256x32xf32, #tpu.memory_space<vmem>>, vector<256x32xf32>,
    return
  }
  func.func @transform_0(%arg0: i32) -> (i32, i32) {
    %c0_i32 = arith.constant 0 : i32
    %c0_i32_0 = arith.constant 0 : i32
    return %arg0, %c0_i32 : i32, i32
  }
  func.func @transform_1(%arg0: i32) -> (i32, i32) {
    %c0_i32 = arith.constant 0 : i32
    %c0_i32_0 = arith.constant 0 : i32
    %c0_i32_1 = arith.constant 0 : i32
    return %c0_i32, %c0_i32_0 : i32, i32
  }
  func.func @transform_2(%arg0: i32) -> (i32, i32) {
    %c0_i32 = arith.constant 0 : i32
    %c0_i32_0 = arith.constant 0 : i32
    %c0_i32_1 = arith.constant 0 : i32
    return %c0_i32, %c0_i32_0 : i32, i32
  }
  func.func @transform_3(%arg0: i32) -> (i32, i32) {
    %c0_i32 = arith.constant 0 : i32
    %c0_i32_0 = arith.constant 0 : i32
    %c0_i32_1 = arith.constant 0 : i32
    return %c0_i32, %c0_i32_0 : i32, i32
  }
  func.func @transform_4(%arg0: i32) -> (i32, i32) {
    %c0_i32 = arith.constant 0 : i32
    %c0_i32_0 = arith.constant 0 : i32
    return %arg0, %c0_i32 : i32, i32
  }
}

</mosaic_0001>

<bundles_post_ra>
// kernel: matmul_affine.1
= control target key start
LH: loop header
LB: loop body
LE: loop exit
PB: predicated region body
PF: predicated region fallthrough
CT: control target
= control target key end

     0   :  { %s911_s15 = smov 0   ;;  %s1112_s0 = inlined_call_operand.vmem [shape: bf16[2048,27], index: 0, kind: input, shape index: {}]   ;;  %s1113_s1 = inlined_call_operand.vmem [shape: bf16[27,32], index: 1, kind: input, shape index: {}]   ;;  %s1114_s2 = inlined_call_operand.vmem [shape: f32[1,32], index: 2, kind: input, shape index: {}]   ;;  %s1115_s3 = inlined_call_operand.vmem [shape: f32[1,32], index: 3, kind: input, shape index: {}]   ;;  %s1116_s4 = inlined_call_operand.vmem [shape: f32[2048,32], index: 4, kind: output, shape index: {}]  }
   0x1 LB: > { %s745_s16 = sadd.s32 4294967295, %s883_s15   ;;  %p749_p0 = scmp.ge.s32.totalorder %s883_s15, 1  ;;  %s883_s15 = sphi %s911_s15, %s14_s15  }
   0x2   : > { %p163_p1 = scmp.lt.s32.totalorder %s883_s15, 9 }
   0x4   : > { %p164_p2 = pnand %p749_p0, %p163_p1 }
   0x5   : > { %v859_v0 = vld [vmem:[%s1113_s1] sm:$0xff] (!%p164_p2)   ;;  %vm378_vm0 = vcmask (!%p164_p2), 1044480   ;;  %v860_v1 = vld [vmem:[%s1113_s1 + $0x8] sm:$0x3f] (!%p164_p2)   ;;  %vm379_vm1 = vcmask (!%p164_p2), 1045504   ;;  %s750_s21 = sshll.u32 (!%p164_p2), %s745_s16, 5 }
   0x6   : > { %167 = sbr.rel (%p164_p2) target bundleno = 265 (0x109), region = 36  ;;  %810 = vmatprep.subr.bf16.mxu0 (!%p164_p2), %v859_v0  ;;  %846 = vmatprep.subr.bf16.mxu1 (!%p164_p2), %v859_v0  ;;  %v885_v2 = vmov (!%p164_p2), 65535   ;;  %p190_p3 = scmp.lt.s32.totalorder (!%p164_p2), %s750_s21, 255  ;;  %vm329_vm2 = vcmask (!%p164_p2), 220160   ;;  %v968_v22 = vld [vmem:[%s1114_s2] ss:$0 sm:$0xff] (!%p164_p2) }
   0x7   : > { %811 = vmatpush3.bf16.msra.mxu0 (!%p164_p2), %v859_v0  ;;  %848 = vmatpush3.bf16.msra.mxu1 (!%p164_p2), %v859_v0  ;;  %v380_v3 = vsel (!%p164_p2), %vm378_vm0, 4294967295, %v885_v2  ;;  %v973_v24 = vld [vmem:[%s1115_s3] ss:$0 sm:$0xff] (!%p164_p2)  ;;  %vm656_vm3 = vcmask (!%p164_p2), 261120  }
   0x8   : > { %v381_v4 = vsel (!%p164_p2), %vm379_vm1, %v380_v3, 0 }
   0x9   : > { %v383_v5 = vand.u32 (!%p164_p2), %v860_v1, %v381_v4 }
   0xb   : > { %812 = vmatprep.subr.bf16.mxu0 (!%p164_p2), %v383_v5  ;;  %847 = vmatprep.subr.bf16.mxu1 (!%p164_p2), %v383_v5 }
   0xc   : > { %813 = vmatpush3.bf16.msra.mxu0 (!%p164_p2), %v383_v5  ;;  %849 = vmatpush3.bf16.msra.mxu1 (!%p164_p2), %v383_v5 }
   0xd   : > { %s1118_s21 = smov (!%p190_p3, %s750_s21), 255 }
   0xe   : > { %s751_s22 = sshll.u32 %s1118_s21, 2  ;;  %s753_s30 = sshll.u32 %s1118_s21, 3 }
   0xf   : > { %s931_s25 = scalar_lea.vmem %s1112_s0, %s751_s22  ;;  %s985_s7 = scalar_lea.vmem %s1116_s4, %s753_s30 }
  0x10   : > { %v861_v6 = vld [vmem:[%s931_s25] sm:$0xff]   ;;  %v863_v8 = vld [vmem:[%s931_s25 + $0x8] sm:$0xff]   ;;  %v865_v10 = vld [vmem:[%s931_s25 + $0x10] sm:$0xff]  }
  0x11   : > { %v862_v7 = vld [vmem:[%s931_s25 + $0x40] sm:$0xff]   ;;  %814 = vmatprep.mubr.msk.bf16.mxu0 %vm329_vm2, %v861_v6  ;;  %v864_v9 = vld [vmem:[%s931_s25 + $0x48] sm:$0xff]   ;;  %v866_v11 = vld [vmem:[%s931_s25 + $0x50] sm:$0xff]  }
  0x12   : > { %830 = vmatprep.mubr.msk.bf16.mxu1 %vm329_vm2, %v862_v7  ;;  %815 = vmatmul.mubr.msk.bf16.vlgmr.msra.gmra.mrb[0].mxu0 %vm329_vm2, %v863_v8  ;;  %v867_v12 = vld [vmem:[%s931_s25 + $0x18] sm:$0xff]   ;;  %v869_v14 = vld [vmem:[%s931_s25 + $0x20] sm:$0xff]   ;;  %v871_v16 = vld [vmem:[%s931_s25 + $0x28] sm:$0xff]  }
  0x13   : > { %831 = vmatmul.mubr.msk.bf16.vlgmr.msra.gmra.mrb[0].mxu1 %vm329_vm2, %v864_v9  ;;  %818 = vmatprep.mubr.msk.bf16.mxu0 %vm329_vm2, %v865_v10  ;;  %v868_v13 = vld [vmem:[%s931_s25 + $0x58] sm:$0xff]   ;;  %v870_v15 = vld [vmem:[%s931_s25 + $0x60] sm:$0xff]   ;;  %v872_v17 = vld [vmem:[%s931_s25 + $0x68] sm:$0xff]  }
  0x14   : > { %834 = vmatprep.mubr.msk.bf16.mxu1 %vm329_vm2, %v866_v11  ;;  %v873_v18 = vld [vmem:[%s931_s25 + $0x30] sm:$0xff]   ;;  %v875_v20 = vld [vmem:[%s931_s25 + $0x38] sm:$0xff]  }
  0x15   : > { %v874_v19 = vld [vmem:[%s931_s25 + $0x70] sm:$0xff]   ;;  %v876_v21 = vld [vmem:[%s931_s25 + $0x78] sm:$0xff]  }
  0x1a   : > { %819 = vmatmul.mubr.msk.bf16.gmra.mrb[4].mxu0 %vm329_vm2, %v867_v12 }
  0x1b   : > { %835 = vmatmul.mubr.msk.bf16.gmra.mrb[4].mxu1 %vm329_vm2, %v868_v13  ;;  %822 = vmatprep.mubr.msk.bf16.mxu0 %vm329_vm2, %v869_v14 }
  0x1c   : > { %838 = vmatprep.mubr.msk.bf16.mxu1 %vm329_vm2, %v870_v15 }
  0x22   : > { %823 = vmatmul.mubr.msk.bf16.gmra.mrb[8].mxu0 %vm329_vm2, %v871_v16 }
  0x23   : > { %839 = vmatmul.mubr.msk.bf16.gmra.mrb[8].mxu1 %vm329_vm2, %v872_v17  ;;  %826 = vmatprep.mubr.msk.bf16.mxu0 %vm329_vm2, %v873_v18 }
  0x24   : > { %842 = vmatprep.mubr.msk.bf16.mxu1 %vm329_vm2, %v874_v19 }
  0x2a   : > { %827 = vmatmul.mubr.msk.bf16.gmra.mrb[12].mxu0 %vm329_vm2, %v875_v20 }
  0x2b   : > { %843 = vmatmul.mubr.msk.bf16.gmra.mrb[12].mxu1 %vm329_vm2, %v876_v21 }
  0xe5   : > { %v816_v23 = vpop.f32.mrb[0].mxu0 }
  0xe6   : > { %v555_v25 = vmul.f32 %v816_v23, %v968_v22  ;;  %v832_v26 = vpop.f32.mrb[0].mxu1  ;;  %v419_v27 = vpop.f32.mrb[1].mxu0 }
  0xe7   : > { %v571_v28 = vmul.f32 %v832_v26, %v968_v22  ;;  %v553_v29 = vmul.f32 %v968_v22, %v419_v27  ;;  %v483_v30 = vpop.f32.mrb[1].mxu1  ;;  %v817_v31 = vpop.f32.mrb[2].mxu0 }
  0xe8   : > { %v594_v32 = vadd.f32 %v973_v24, %v555_v25  ;;  %v569_v33 = vmul.f32 %v968_v22, %v483_v30  ;;  %v556_v34 = vmul.f32 %v817_v31, %v968_v22  ;;  %v833_v35 = vpop.f32.mrb[2].mxu1  ;;  %v422_v36 = vpop.f32.mrb[3].mxu0 }
  0xe9   : > { %v610_v37 = vadd.f32 %v973_v24, %v571_v28  ;;  %v592_v38 = vadd.f32 %v973_v24, %v553_v29  ;;  %v572_v39 = vmul.f32 %v833_v35, %v968_v22  ;;  %v554_v40 = vmul.f32 %v968_v22, %v422_v36  ;;  %v486_v41 = vpop.f32.mrb[3].mxu1 }
  0xea   : > { %v626_v42 = vmax.f32 %v594_v32, 0.0  ;;  %v608_v43 = vadd.f32 %v973_v24, %v569_v33  ;;  %v595_v44 = vadd.f32 %v973_v24, %v556_v34  ;;  %v570_v45 = vmul.f32 %v968_v22, %v486_v41 }
  0xeb   : > { %v642_v46 = vmax.f32 %v610_v37, 0.0  ;;  %v624_v47 = vmax.f32 %v592_v38, 0.0  ;;  %v611_v48 = vadd.f32 %v973_v24, %v572_v39  ;;  %v593_v49 = vadd.f32 %v973_v24, %v554_v40 }
  0xec   : > { %659 = vst.msk [vmem:[%s985_s7 + $0x10] sm:$0xff] %vm656_vm3, %v626_v42  ;;  %v640_v50 = vmax.f32 %v608_v43, 0.0  ;;  %v627_v51 = vmax.f32 %v595_v44, 0.0  ;;  %v609_v52 = vadd.f32 %v973_v24, %v570_v45 }
  0xed   : > { %675 = vst.msk [vmem:[%s985_s7 + $0x90] sm:$0xff] %vm656_vm3, %v642_v46  ;;  %657 = vst.msk [vmem:[%s985_s7] sm:$0xff] %vm656_vm3, %v624_v47  ;;  %v643_v53 = vmax.f32 %v611_v48, 0.0  ;;  %v625_v54 = vmax.f32 %v593_v49, 0.0  ;;  %v820_v55 = vpop.f32.mrb[4].mxu0 }
  0xee   : > { %673 = vst.msk [vmem:[%s985_s7 + $0x80] sm:$0xff] %vm656_vm3, %v640_v50  ;;  %660 = vst.msk [vmem:[%s985_s7 + $0x18] sm:$0xff] %vm656_vm3, %v627_v51  ;;  %v641_v56 = vmax.f32 %v609_v52, 0.0  ;;  %v559_v57 = vmul.f32 %v820_v55, %v968_v22  ;;  %v836_v58 = vpop.f32.mrb[4].mxu1  ;;  %v435_v59 = vpop.f32.mrb[5].mxu0 }
  0xef   : > { %676 = vst.msk [vmem:[%s985_s7 + $0x98] sm:$0xff] %vm656_vm3, %v643_v53  ;;  %658 = vst.msk [vmem:[%s985_s7 + $0x8] sm:$0xff] %vm656_vm3, %v625_v54  ;;  %v575_v60 = vmul.f32 %v836_v58, %v968_v22  ;;  %v557_v61 = vmul.f32 %v968_v22, %v435_v59  ;;  %v499_v62 = vpop.f32.mrb[5].mxu1  ;;  %v821_v63 = vpop.f32.mrb[6].mxu0 }
  0xf0   : > { %674 = vst.msk [vmem:[%s985_s7 + $0x88] sm:$0xff] %vm656_vm3, %v641_v56  ;;  %v598_v0 = vadd.f32 %v973_v24, %v559_v57  ;;  %v573_v1 = vmul.f32 %v968_v22, %v499_v62  ;;  %v560_v2 = vmul.f32 %v821_v63, %v968_v22  ;;  %v837_v3 = vpop.f32.mrb[6].mxu1  ;;  %v438_v4 = vpop.f32.mrb[7].mxu0 }
  0xf1   : > { %v614_v5 = vadd.f32 %v973_v24, %v575_v60  ;;  %v596_v6 = vadd.f32 %v973_v24, %v557_v61  ;;  %v576_v7 = vmul.f32 %v837_v3, %v968_v22  ;;  %v558_v8 = vmul.f32 %v968_v22, %v438_v4  ;;  %v502_v9 = vpop.f32.mrb[7].mxu1 }
  0xf2   : > { %v630_v10 = vmax.f32 %v598_v0, 0.0  ;;  %v612_v11 = vadd.f32 %v973_v24, %v573_v1  ;;  %v599_v12 = vadd.f32 %v973_v24, %v560_v2  ;;  %v574_v13 = vmul.f32 %v968_v22, %v502_v9 }
  0xf3   : > { %v646_v14 = vmax.f32 %v614_v5, 0.0  ;;  %v628_v15 = vmax.f32 %v596_v6, 0.0  ;;  %v615_v16 = vadd.f32 %v973_v24, %v576_v7  ;;  %v597_v17 = vadd.f32 %v973_v24, %v558_v8 }
  0xf4   : > { %663 = vst.msk [vmem:[%s985_s7 + $0x30] sm:$0xff] %vm656_vm3, %v630_v10  ;;  %v644_v18 = vmax.f32 %v612_v11, 0.0  ;;  %v631_v19 = vmax.f32 %v599_v12, 0.0  ;;  %v613_v20 = vadd.f32 %v973_v24, %v574_v13 }
  0xf5   : > { %679 = vst.msk [vmem:[%s985_s7 + $0xb0] sm:$0xff] %vm656_vm3, %v646_v14  ;;  %661 = vst.msk [vmem:[%s985_s7 + $0x20] sm:$0xff] %vm656_vm3, %v628_v15  ;;  %v647_v21 = vmax.f32 %v615_v16, 0.0  ;;  %v629_v23 = vmax.f32 %v597_v17, 0.0  ;;  %v824_v25 = vpop.f32.mrb[8].mxu0 }
  0xf6   : > { %677 = vst.msk [vmem:[%s985_s7 + $0xa0] sm:$0xff] %vm656_vm3, %v644_v18  ;;  %664 = vst.msk [vmem:[%s985_s7 + $0x38] sm:$0xff] %vm656_vm3, %v631_v19  ;;  %v645_v26 = vmax.f32 %v613_v20, 0.0  ;;  %v563_v27 = vmul.f32 %v824_v25, %v968_v22  ;;  %v840_v28 = vpop.f32.mrb[8].mxu1  ;;  %v451_v29 = vpop.f32.mrb[9].mxu0 }
  0xf7   : > { %680 = vst.msk [vmem:[%s985_s7 + $0xb8] sm:$0xff] %vm656_vm3, %v647_v21  ;;  %662 = vst.msk [vmem:[%s985_s7 + $0x28] sm:$0xff] %vm656_vm3, %v629_v23  ;;  %v579_v30 = vmul.f32 %v840_v28, %v968_v22  ;;  %v561_v31 = vmul.f32 %v968_v22, %v451_v29  ;;  %v515_v32 = vpop.f32.mrb[9].mxu1  ;;  %v825_v33 = vpop.f32.mrb[10].mxu0 }
  0xf8   : > { %678 = vst.msk [vmem:[%s985_s7 + $0xa8] sm:$0xff] %vm656_vm3, %v645_v26  ;;  %v602_v34 = vadd.f32 %v973_v24, %v563_v27  ;;  %v577_v35 = vmul.f32 %v968_v22, %v515_v32  ;;  %v564_v36 = vmul.f32 %v825_v33, %v968_v22  ;;  %v841_v37 = vpop.f32.mrb[10].mxu1  ;;  %v454_v38 = vpop.f32.mrb[11].mxu0 }
  0xf9   : > { %v618_v39 = vadd.f32 %v973_v24, %v579_v30  ;;  %v600_v40 = vadd.f32 %v973_v24, %v561_v31  ;;  %v580_v41 = vmul.f32 %v841_v37, %v968_v22  ;;  %v562_v42 = vmul.f32 %v968_v22, %v454_v38  ;;  %v518_v43 = vpop.f32.mrb[11].mxu1 }
  0xfa   : > { %v634_v44 = vmax.f32 %v602_v34, 0.0  ;;  %v616_v45 = vadd.f32 %v973_v24, %v577_v35  ;;  %v603_v46 = vadd.f32 %v973_v24, %v564_v36  ;;  %v578_v47 = vmul.f32 %v968_v22, %v518_v43 }
  0xfb   : > { %v650_v48 = vmax.f32 %v618_v39, 0.0  ;;  %v632_v49 = vmax.f32 %v600_v40, 0.0  ;;  %v619_v50 = vadd.f32 %v973_v24, %v580_v41  ;;  %v601_v51 = vadd.f32 %v973_v24, %v562_v42 }
  0xfc   : > { %667 = vst.msk [vmem:[%s985_s7 + $0x50] sm:$0xff] %vm656_vm3, %v634_v44  ;;  %v648_v52 = vmax.f32 %v616_v45, 0.0  ;;  %v635_v53 = vmax.f32 %v603_v46, 0.0  ;;  %v617_v54 = vadd.f32 %v973_v24, %v578_v47 }
  0xfd   : > { %683 = vst.msk [vmem:[%s985_s7 + $0xd0] sm:$0xff] %vm656_vm3, %v650_v48  ;;  %665 = vst.msk [vmem:[%s985_s7 + $0x40] sm:$0xff] %vm656_vm3, %v632_v49  ;;  %v651_v55 = vmax.f32 %v619_v50, 0.0  ;;  %v633_v56 = vmax.f32 %v601_v51, 0.0  ;;  %v828_v57 = vpop.f32.mrb[12].mxu0 }
  0xfe   : > { %681 = vst.msk [vmem:[%s985_s7 + $0xc0] sm:$0xff] %vm656_vm3, %v648_v52  ;;  %668 = vst.msk [vmem:[%s985_s7 + $0x58] sm:$0xff] %vm656_vm3, %v635_v53  ;;  %v649_v58 = vmax.f32 %v617_v54, 0.0  ;;  %v567_v59 = vmul.f32 %v828_v57, %v968_v22  ;;  %v844_v60 = vpop.f32.mrb[12].mxu1  ;;  %v467_v61 = vpop.f32.mrb[13].mxu0 }
  0xff   : > { %684 = vst.msk [vmem:[%s985_s7 + $0xd8] sm:$0xff] %vm656_vm3, %v651_v55  ;;  %666 = vst.msk [vmem:[%s985_s7 + $0x48] sm:$0xff] %vm656_vm3, %v633_v56  ;;  %v583_v62 = vmul.f32 %v844_v60, %v968_v22  ;;  %v565_v63 = vmul.f32 %v968_v22, %v467_v61  ;;  %v531_v0 = vpop.f32.mrb[13].mxu1  ;;  %v829_v1 = vpop.f32.mrb[14].mxu0 }
 0x100   : > { %682 = vst.msk [vmem:[%s985_s7 + $0xc8] sm:$0xff] %vm656_vm3, %v649_v58  ;;  %v606_v2 = vadd.f32 %v973_v24, %v567_v59  ;;  %v581_v3 = vmul.f32 %v968_v22, %v531_v0  ;;  %v568_v4 = vmul.f32 %v829_v1, %v968_v22  ;;  %v845_v5 = vpop.f32.mrb[14].mxu1  ;;  %v470_v6 = vpop.f32.mrb[15].mxu0 }
 0x101   : > { %v622_v7 = vadd.f32 %v973_v24, %v583_v62  ;;  %v604_v8 = vadd.f32 %v973_v24, %v565_v63  ;;  %v584_v9 = vmul.f32 %v845_v5, %v968_v22  ;;  %v566_v10 = vmul.f32 %v968_v22, %v470_v6  ;;  %v534_v11 = vpop.f32.mrb[15].mxu1 }
 0x102   : > { %v638_v12 = vmax.f32 %v606_v2, 0.0  ;;  %v620_v13 = vadd.f32 %v973_v24, %v581_v3  ;;  %v607_v14 = vadd.f32 %v973_v24, %v568_v4  ;;  %v582_v15 = vmul.f32 %v968_v22, %v534_v11 }
 0x103   : > { %v654_v16 = vmax.f32 %v622_v7, 0.0  ;;  %v636_v17 = vmax.f32 %v604_v8, 0.0  ;;  %v623_v18 = vadd.f32 %v973_v24, %v584_v9  ;;  %v605_v19 = vadd.f32 %v973_v24, %v566_v10 }
 0x104   : > { %671 = vst.msk [vmem:[%s985_s7 + $0x70] sm:$0xff] %vm656_vm3, %v638_v12  ;;  %v652_v20 = vmax.f32 %v620_v13, 0.0  ;;  %v639_v21 = vmax.f32 %v607_v14, 0.0  ;;  %v621_v23 = vadd.f32 %v973_v24, %v582_v15 }
 0x105   : > { %687 = vst.msk [vmem:[%s985_s7 + $0xf0] sm:$0xff] %vm656_vm3, %v654_v16  ;;  %669 = vst.msk [vmem:[%s985_s7 + $0x60] sm:$0xff] %vm656_vm3, %v636_v17  ;;  %v655_v22 = vmax.f32 %v623_v18, 0.0  ;;  %v637_v25 = vmax.f32 %v605_v19, 0.0 }
 0x106   : > { %685 = vst.msk [vmem:[%s985_s7 + $0xe0] sm:$0xff] %vm656_vm3, %v652_v20  ;;  %672 = vst.msk [vmem:[%s985_s7 + $0x78] sm:$0xff] %vm656_vm3, %v639_v21  ;;  %v653_v26 = vmax.f32 %v621_v23, 0.0 }
 0x107   : > { %688 = vst.msk [vmem:[%s985_s7 + $0xf8] sm:$0xff] %vm656_vm3, %v655_v22  ;;  %670 = vst.msk [vmem:[%s985_s7 + $0x68] sm:$0xff] %vm656_vm3, %v637_v25 }
 0x108   : > { %686 = vst.msk [vmem:[%s985_s7 + $0xe8] sm:$0xff] %vm656_vm3, %v653_v26 }
 0x109 PF: > { %s14_s15 = sadd.s32 1, %s883_s15  }
 0x10a   : > { %p11_p4 = scmp.ge.s32.totalorder %s14_s15, 10  }
 0x10c   :  { %13 = sbr.rel (!%p11_p4) target bundleno = 1 (0x1), region = 66 }

</bundles_post_ra>
